<compile_context>
chip_gen: v6e
topology: v6e:2x2x1
jax: 0.10.0
libtpu: 0.0.40
codegen_flags: <defaults>
</compile_context>

<pallas_src>
import functools

import jax
import jax.numpy as jnp
from jax.experimental import pallas as pl
from jax.experimental.pallas import tpu as pltpu


_BN_EPS = 1e-5


# ----------------------------- helpers --------------------------------------------------

def _round_up(x, m):
    return ((x + m - 1) // m) * m


def _pick_tile(dim, cap, mult):
    """Largest tile <= cap (multiple of `mult`) that minimizes padding of `dim`."""
    dim_r = _round_up(dim, mult)
    if dim_r <= cap:
        return dim_r
    best_t, best_pad = None, None
    for t in range(cap, 0, -mult):
        pad = _round_up(dim_r, t) - dim_r
        if best_pad is None or pad < best_pad:
            best_t, best_pad = t, pad
        if pad == 0:
            break
    return best_t


def _vmem_limit_bytes():
    # Per-generation budget: ~half of physical VMEM, capped at 64 MiB.
    try:
        info = pltpu.get_tpu_info()
        cap = getattr(info, "vmem_capacity_bytes", None)
        if cap:
            return int(min(64 * 1024 * 1024, cap // 2))
    except Exception:
        pass
    return 32 * 1024 * 1024          # safe everywhere (v7x has 64 MiB physical)


_VMEM_LIMIT = _vmem_limit_bytes()


# ----------------------------- Pallas kernels -------------------------------------------

def _mm_kernel(a_ref, b_ref, shift_ref, *rest, relu, has_residual):
    """Tiled matmul with f32 accumulator; epilogue = +shift (+residual) (+ReLU)."""
    if has_residual:
        r_ref, o_ref, acc_ref = rest
    else:
        r_ref = None
        o_ref, acc_ref = rest

    k = pl.program_id(2)

    @pl.when(k == 0)
    def _init():
        acc_ref[...] = jnp.zeros_like(acc_ref)

    acc_ref[...] += jnp.dot(a_ref[...], b_ref[...],
                            preferred_element_type=jnp.float32)

    @pl.when(k == pl.num_programs(2) - 1)
    def _finalize():
        out = acc_ref[...] + shift_ref[...]
        if has_residual:
            out = out + r_ref[...].astype(jnp.float32)
        if relu:
            out = jnp.maximum(out, 0.0)
        o_ref[...] = out.astype(o_ref.dtype)


def _reduce_max_kernel(x_ref, o_ref):
    m = x_ref[0]
    for i in range(1, x_ref.shape[0]):
        m = jnp.maximum(m, x_ref[i])
    o_ref[...] = m.astype(o_ref.dtype)


def _reduce_mean_kernel(x_ref, o_ref):
    s = x_ref[0].astype(jnp.float32)
    for i in range(1, x_ref.shape[0]):
        s = s + x_ref[i].astype(jnp.float32)
    o_ref[...] = (s * (1.0 / x_ref.shape[0])).astype(o_ref.dtype)


# ----------------------------- cached pallas_call builders ------------------------------

@functools.lru_cache(maxsize=None)
def _build_matmul(Mp, Kp, Np, tm, tk, tn, relu, has_residual, out_dtype):
    kernel = functools.partial(_mm_kernel, relu=relu, has_residual=has_residual)
    in_specs = [
        pl.BlockSpec((tm, tk), lambda i, j, k: (i, k)),
        pl.BlockSpec((tk, tn), lambda i, j, k: (k, j)),
        pl.BlockSpec((1, tn), lambda i, j, k: (0, j)),
    ]
    if has_residual:
        in_specs.append(pl.BlockSpec((tm, tn), lambda i, j, k: (i, j)))
    call = pl.pallas_call(
        kernel,
        out_shape=jax.ShapeDtypeStruct((Mp, Np), out_dtype),
        grid_spec=pltpu.PrefetchScalarGridSpec(
            num_scalar_prefetch=0,
            grid=(Mp // tm, Np // tn, Kp // tk),
            in_specs=in_specs,
            out_specs=pl.BlockSpec((tm, tn), lambda i, j, k: (i, j)),
            scratch_shapes=[pltpu.VMEM((tm, tn), jnp.float32)],
        ),
        compiler_params=pltpu.CompilerParams(
            dimension_semantics=("parallel", "parallel", "arbitrary"),
            vmem_limit_bytes=_VMEM_LIMIT,
        ),
    )
    return jax.jit(call)


@functools.lru_cache(maxsize=None)
def _build_reduce_max(P, Mp, C, tm, dtype):
    call = pl.pallas_call(
        _reduce_max_kernel,
        out_shape=jax.ShapeDtypeStruct((Mp, C), dtype),
        grid_spec=pltpu.PrefetchScalarGridSpec(
            num_scalar_prefetch=0,
            grid=(Mp // tm,),
            in_specs=[pl.BlockSpec((P, tm, C), lambda i: (0, i, 0))],
            out_specs=pl.BlockSpec((tm, C), lambda i: (i, 0)),
        ),
        compiler_params=pltpu.CompilerParams(
            dimension_semantics=("parallel",),
            vmem_limit_bytes=_VMEM_LIMIT,
        ),
    )
    return jax.jit(call)


@functools.lru_cache(maxsize=None)
def _build_reduce_mean(P, M, C):
    call = pl.pallas_call(
        _reduce_mean_kernel,
        out_shape=jax.ShapeDtypeStruct((M, C), jnp.float32),
        grid_spec=pltpu.PrefetchScalarGridSpec(
            num_scalar_prefetch=0,
            grid=(1,),
            in_specs=[pl.BlockSpec((P, M, C), lambda i: (0, 0, 0))],
            out_specs=pl.BlockSpec((M, C), lambda i: (0, 0)),
        ),
        compiler_params=pltpu.CompilerParams(vmem_limit_bytes=_VMEM_LIMIT),
    )
    return jax.jit(call)


# ----------------------------- op wrappers ----------------------------------------------

def matmul_bn_act(a, b, shift, relu, residual=None, out_dtype=jnp.bfloat16):
    """maybe_relu((a @ b) + shift [+ residual]); a/b in bf16, epilogue in f32."""
    M, K = a.shape
    K2, N = b.shape
    assert K == K2
    tm = _pick_tile(M, 256, 16)        # sublane-packed bf16 tiles
    tn = _pick_tile(N, 256, 128)       # lane-dense output
    tk = _pick_tile(K, 1024, 128)
    Mp, Kp, Np = _round_up(M, tm), _round_up(K, tk), _round_up(N, tn)

    a_p = jnp.pad(a.astype(jnp.bfloat16), ((0, Mp - M), (0, Kp - K)))
    b_p = jnp.pad(b.astype(jnp.bfloat16), ((0, Kp - K), (0, Np - N)))
    s_p = jnp.pad(shift.astype(jnp.float32), (0, Np - N)).reshape(1, Np)
    args = [a_p, b_p, s_p]
    if residual is not None:
        args.append(jnp.pad(residual.astype(jnp.bfloat16),
                            ((0, Mp - M), (0, Np - N))))

    fn = _build_matmul(Mp, Kp, Np, tm, tk, tn, bool(relu),
                       residual is not None, out_dtype)
    out = fn(*args)
    if Mp != M or Np != N:
        out = out[:M, :N]
    return out


def conv_bn(x, fp, stride, padding, relu, residual=None):
    """x: NHWC bf16; fp holds the BN-folded bf16 weight matrix and f32 shift."""
    Kh, Kw, Cin, Cout = fp['kh'], fp['kw'], fp['cin'], fp['cout']
    N, H, W, _ = x.shape
    Ho = (H + 2 * padding - Kh) // stride + 1
    Wo = (W + 2 * padding - Kw) // stride + 1
    if Kh == 1 and Kw == 1 and padding == 0:
        a = x[:, ::stride, ::stride, :].reshape(N * Ho * Wo, Cin)
    else:
        xp = jnp.pad(x, ((0, 0), (padding, padding), (padding, padding), (0, 0)))
        cols = [xp[:, kh:kh + (Ho - 1) * stride + 1:stride,
                   kw:kw + (Wo - 1) * stride + 1:stride, :]
                for kh in range(Kh) for kw in range(Kw)]
        a = jnp.stack(cols, axis=3).reshape(N * Ho * Wo, Kh * Kw * Cin)
    res2d = None if residual is None else residual.reshape(N * Ho * Wo, Cout)
    out = matmul_bn_act(a, fp['b'], fp['shift'], relu, residual=res2d)
    return out.reshape(N, Ho, Wo, Cout)


def max_pool_3x3_s2_p1(x):
    N, H, W, C = x.shape
    Ho = (H + 2 - 3) // 2 + 1
    Wo = (W + 2 - 3) // 2 + 1
    xp = jnp.pad(x, ((0, 0), (1, 1), (1, 1), (0, 0)), constant_values=-jnp.inf)
    patches = [xp[:, kh:kh + (Ho - 1) * 2 + 1:2, kw:kw + (Wo - 1) * 2 + 1:2, :]
               for kh in range(3) for kw in range(3)]
    M = N * Ho * Wo
    p = jnp.stack(patches, axis=0).reshape(9, M, C)
    tm = _pick_tile(M, 256, 16)
    Mp = _round_up(M, tm)
    if Mp != M:
        p = jnp.pad(p, ((0, 0), (0, Mp - M), (0, 0)), constant_values=-jnp.inf)
    out = _build_reduce_max(9, Mp, C, tm, x.dtype)(p)
    if Mp != M:
        out = out[:M]
    return out.reshape(N, Ho, Wo, C)


def global_avg_pool(x):
    N, H, W, C = x.shape
    p = jnp.transpose(x.reshape(N, H * W, C), (1, 0, 2)).astype(jnp.float32)
    return _build_reduce_mean(H * W, N, C)(p)        # (N, C) f32


# ----------------------------- ResNet-101 structure -------------------------------------

def bottleneck(x, bp):
    s = bp['stride']
    out = conv_bn(x, bp['conv1'], stride=1, padding=0, relu=True)
    out = conv_bn(out, bp['conv2'], stride=s, padding=1, relu=True)   # stride on 3x3
    if 'downsample' in bp:
        identity = conv_bn(x, bp['downsample'], stride=s, padding=0, relu=False)
    else:
        identity = x
    # conv3 with the residual add + ReLU fused into the matmul epilogue
    return conv_bn(out, bp['conv3'], stride=1, padding=0, relu=True,
                   residual=identity)


def resnet_facial_net_forward(params, x_nchw):
    x = jnp.transpose(x_nchw, (0, 2, 3, 1)).astype(jnp.bfloat16)   # NCHW -> NHWC bf16
    x = conv_bn(x, params['conv1'], stride=2, padding=3, relu=True)
    x = max_pool_3x3_s2_p1(x)
    for blocks in params['layers']:
        for bp in blocks:
            x = bottleneck(x, bp)
    feat = global_avg_pool(x)                                      # (N, 2048) f32
    return matmul_bn_act(feat, params['fc_w_t'], params['fc_b'],
                         relu=False, out_dtype=jnp.float32)        # (N, out_channel)


# ----------------------------- parameters -----------------------------------------------

def _conv_bn_params(key, cin, cout, k):
    std = 0.5 * (2.0 / (cin * k * k)) ** 0.5
    return {
        'w': std * jax.random.normal(key, (cout, cin, k, k), jnp.float32),
        'gamma': jnp.ones((cout,), jnp.float32),
        'beta': jnp.zeros((cout,), jnp.float32),
        'mean': jnp.zeros((cout,), jnp.float32),
        'var': jnp.ones((cout,), jnp.float32),
    }


def init_resnet101_params(seed, out_channel):
    key = jax.random.PRNGKey(seed)

    def nk():
        nonlocal key
        key, sub = jax.random.split(key)
        return sub

    params = {'conv1': _conv_bn_params(nk(), 3, 64, 7)}
    cfg = [(64, 3, 1), (128, 4, 2), (256, 23, 2), (512, 3, 2)]   # ResNet-101
    inplanes = 64
    layers = []
    for planes, nblocks, stride in cfg:
        blocks = []
        for bi in range(nblocks):
            s = stride if bi == 0 else 1
            bp = {
                'stride': s,
                'conv1': _conv_bn_params(nk(), inplanes, planes, 1),
                'conv2': _conv_bn_params(nk(), planes, planes, 3),
                'conv3': _conv_bn_params(nk(), planes, planes * 4, 1),
            }
            if s != 1 or inplanes != planes * 4:
                bp['downsample'] = _conv_bn_params(nk(), inplanes, planes * 4, 1)
            blocks.append(bp)
            inplanes = planes * 4
        layers.append(blocks)
    params['layers'] = layers
    params['fc_w'] = (1.0 / 2048.0) ** 0.5 * jax.random.normal(
        nk(), (out_channel, 2048), jnp.float32)
    params['fc_b'] = 0.01 * jax.random.normal(nk(), (out_channel,), jnp.float32)
    return params


def fold_params(raw):
    """Fold BN into bf16 weight matrices (scale baked into columns) + f32 shift."""
    def fold_cb(p):
        w = p['w']
        Cout, Cin, Kh, Kw = w.shape
        scale = p['gamma'] / jnp.sqrt(p['var'] + _BN_EPS)
        shift = p['beta'] - p['mean'] * scale
        b = (jnp.transpose(w, (2, 3, 1, 0)).reshape(Kh * Kw * Cin, Cout)
             * scale[None, :]).astype(jnp.bfloat16)
        return {'b': b, 'shift': shift.astype(jnp.float32),
                'kh': Kh, 'kw': Kw, 'cin': Cin, 'cout': Cout}

    folded = {'conv1': fold_cb(raw['conv1']), 'layers': []}
    for blocks in raw['layers']:
        fb = []
        for bp in blocks:
            nb = {'stride': bp['stride'],
                  'conv1': fold_cb(bp['conv1']),
                  'conv2': fold_cb(bp['conv2']),
                  'conv3': fold_cb(bp['conv3'])}
            if 'downsample' in bp:
                nb['downsample'] = fold_cb(bp['downsample'])
            fb.append(nb)
        folded['layers'].append(fb)
    folded['fc_w_t'] = raw['fc_w'].T.astype(jnp.bfloat16)   # (2048, out_channel)
    folded['fc_b'] = raw['fc_b'].astype(jnp.float32)
    return folded


# ----------------------------- main ------------------------------------------------------

if __name__ == "__main__":
    in_channel = 3          # ResNet-101 stem always consumes 3 channels
    out_channel = 136       # 68 facial keypoints * (x, y)
    seed = 0

    raw_params = init_resnet101_params(seed=seed, out_channel=out_channel)
    params = fold_params(raw_params)

    key = jax.random.PRNGKey(0)
    x = jax.random.normal(key, (2, in_channel, 32, 32), dtype=jnp.float32)  # NCHW

    y = resnet_facial_net_forward(params, x)
    y = jax.block_until_ready(y)

    assert y.shape == (2, out_channel), y.shape
    assert bool(jnp.all(jnp.isfinite(y))), "non-finite output"
    print("KERNEL_OK")
</pallas_src>

<mosaic_0001>
module attributes {stable_mosaic.version = 11 : i64} {
  func.func @_mm_kernel(%arg0: i32, %arg1: i32, %arg2: i32, %arg3: memref<256x256xbf16, #tpu.memory_space<vmem>>, %arg4: memref<256x128xbf16, #tpu.memory_space<vmem>>, %arg5: memref<1x128xf32, #tpu.memory_space<vmem>>, %arg6: memref<256x128xbf16, #tpu.memory_space<vmem>>, %arg7: memref<256x128xf32, #tpu.memory_space<vmem>>) attributes {dimension_semantics = [#tpu.dimension_semantics<parallel>, #tpu.dimension_semantics<parallel>, #tpu.dimension_semantics<arbitrary>], iteration_bounds = array<i64: 2, 1, 1>, scalar_prefetch = 0 : i64, scratch_operands = 1 : i64, tpu.core_type = #tpu.core_type<tc>, window_params = [{transform_indices = @transform_0, window_bounds = array<i64: 256, 256>}, {transform_indices = @transform_1, window_bounds = array<i64: 256, 128>}, {transform_indices = @transform_2, window_bounds = array<i64: 1, 128>}, {transform_indices = @transform_3, window_bounds = array<i64: 256, 128>}]} {
    %c0_i32 = arith.constant 0 : i32
    %0 = arith.cmpi eq, %arg2, %c0_i32 : i32
    %1 = arith.extui %0 : i1 to i32
    %c0_i32_0 = arith.constant 0 : i32
    %2 = arith.cmpi ne, %1, %c0_i32_0 : i32
    scf.if %2 {
      %cst_10 = arith.constant 0.000000e+00 : f32
      %12 = vector.broadcast %cst_10 : f32 to vector<256x128xf32>
      %c0_11 = arith.constant 0 : index
      %c0_12 = arith.constant 0 : index
      %13 = vector.load %arg7[%c0_11, %c0_12] : memref<256x128xf32, #tpu.memory_space<vmem>>, vector<256x128xf32>
      tpu.vector_store %arg7[%c0_11, %c0_12], %12 {strides = array<i32>} : memref<256x128xf32, #tpu.memory_space<vmem>>, vector<256x128xf32>,
    } else {
    }
    %c0 = arith.constant 0 : index
    %c0_1 = arith.constant 0 : index
    %3 = vector.load %arg7[%c0, %c0_1] : memref<256x128xf32, #tpu.memory_space<vmem>>, vector<256x128xf32>
    %c0_2 = arith.constant 0 : index
    %c0_3 = arith.constant 0 : index
    %4 = vector.load %arg3[%c0_2, %c0_3] : memref<256x256xbf16, #tpu.memory_space<vmem>>, vector<256x256xbf16>
    %c0_4 = arith.constant 0 : index
    %c0_5 = arith.constant 0 : index
    %5 = vector.load %arg4[%c0_4, %c0_5] : memref<256x128xbf16, #tpu.memory_space<vmem>>, vector<256x128xbf16>
    %cst = arith.constant dense<0.000000e+00> : vector<256x128xf32>
    %6 = tpu.matmul %4, %5, %cst {dimension_numbers = #tpu.dot_dimension_numbers<[1], [0], [0], [1], [0, 0, 1, 1], [], []>} : vector<256x256xbf16>, vector<256x128xbf16>, vector<256x128xf32> -> vector<256x128xf32>
    %7 = arith.addf %3, %6 : vector<256x128xf32>
    %c0_6 = arith.constant 0 : index
    %c0_7 = arith.constant 0 : index
    %8 = vector.load %arg7[%c0_6, %c0_7] : memref<256x128xf32, #tpu.memory_space<vmem>>, vector<256x128xf32>
    tpu.vector_store %arg7[%c0_6, %c0_7], %7 {strides = array<i32>} : memref<256x128xf32, #tpu.memory_space<vmem>>, vector<256x128xf32>,
    %c0_i32_8 = arith.constant 0 : i32
    %9 = arith.cmpi eq, %arg2, %c0_i32_8 : i32
    %10 = arith.extui %9 : i1 to i32
    %c0_i32_9 = arith.constant 0 : i32
    %11 = arith.cmpi ne, %10, %c0_i32_9 : i32
    scf.if %11 {
      %c0_10 = arith.constant 0 : index
      %c0_11 = arith.constant 0 : index
      %12 = vector.load %arg7[%c0_10, %c0_11] : memref<256x128xf32, #tpu.memory_space<vmem>>, vector<256x128xf32>
      %c0_12 = arith.constant 0 : index
      %c0_13 = arith.constant 0 : index
      %13 = vector.load %arg5[%c0_12, %c0_13] : memref<1x128xf32, #tpu.memory_space<vmem>>, vector<1x128xf32>
      %14 = vector.broadcast %13 : vector<1x128xf32> to vector<256x128xf32>
      %15 = arith.addf %12, %14 : vector<256x128xf32>
      %cst_14 = arith.constant 0.000000e+00 : f32
      %16 = vector.broadcast %cst_14 : f32 to vector<256x128xf32>
      %17 = arith.maximumf %15, %16 : vector<256x128xf32>
      %18 = arith.truncf %17 : vector<256x128xf32> to vector<256x128xbf16>
      %c0_15 = arith.constant 0 : index
      %c0_16 = arith.constant 0 : index
      %19 = vector.load %arg6[%c0_15, %c0_16] : memref<256x128xbf16, #tpu.memory_space<vmem>>, vector<256x128xbf16>
      tpu.vector_store %arg6[%c0_15, %c0_16], %18 {strides = array<i32>} : memref<256x128xbf16, #tpu.memory_space<vmem>>, vector<256x128xbf16>,
    } else {
    }
    return
  }
  func.func @transform_0(%arg0: i32, %arg1: i32, %arg2: i32) -> (i32, i32) {
    %c0_i32 = arith.constant 0 : i32
    return %arg0, %arg2 : i32, i32
  }
  func.func @transform_1(%arg0: i32, %arg1: i32, %arg2: i32) -> (i32, i32) {
    %c0_i32 = arith.constant 0 : i32
    return %arg2, %arg1 : i32, i32
  }
  func.func @transform_2(%arg0: i32, %arg1: i32, %arg2: i32) -> (i32, i32) {
    %c0_i32 = arith.constant 0 : i32
    %c0_i32_0 = arith.constant 0 : i32
    return %c0_i32, %arg1 : i32, i32
  }
  func.func @transform_3(%arg0: i32, %arg1: i32, %arg2: i32) -> (i32, i32) {
    %c0_i32 = arith.constant 0 : i32
    return %arg0, %arg1 : i32, i32
  }
}

</mosaic_0001>

<bundles_post_ra>
// kernel: tpu_custom_call.1
= control target key start
LH: loop header
LB: loop body
LE: loop exit
PB: predicated region body
PF: predicated region fallthrough
CT: control target
= control target key end

     0   :  { %8 = vsyncpa [#allocation4], 0  ;;  %s2211_s0 = inlined_call_operand.hbm [shape: bf16[512,256], index: 0, kind: input, shape index: {}]   ;;  %s2212_s1 = inlined_call_operand.hbm [shape: bf16[256,128], index: 1, kind: input, shape index: {}]   ;;  %s2213_s2 = inlined_call_operand.vmem [shape: f32[1,128], index: 2, kind: input, shape index: {}]   ;;  %s2214_s3 = inlined_call_operand.hbm [shape: bf16[512,128], index: 3, kind: output, shape index: {}]  }
   0x1   :  { %10 = vsyncpa [#allocation4 + $0x1], 0 }
   0x2   :  { %11 = vsyncpa [#allocation7], 0 }
   0x3   :  { %12 = vsyncpa [#allocation5], 0 }
   0x4   :  { %14 = vsyncpa [#allocation5 + $0x1], 0  ;;  %s1939_s12 = smov 0   ;;  %s1941_s13 = smov 0  }
   0x5   :  { %s1943_s14 = smov 0   ;;  %s1945_s15 = smov 0  }
   0x6   :  { %s1947_s16 = smov 0   ;;  %s1949_s17 = smov 0  }
   0x7 LB: > { %s1269_s18 = sadd.s32 4294967295, %s1908_s17   ;;  %s1270_s19 = sadd.s32 4294967294, %s1908_s17   ;;  %s1908_s17 = sphi %s1949_s17, %s20_s17   ;;  %s1904_s16 = sphi %s1947_s16, %s2232_s16   ;;  %s1900_s15 = sphi %s1945_s15, %s2231_s15   ;;  %s1896_s14 = sphi %s1943_s14, %s2230_s14   ;;  %s1892_s13 = sphi %s1941_s13, %s2229_s13   ;;  %s1888_s12 = sphi %s1939_s12, %s2228_s12  }
   0x8   : > { %p61_p0 = scmp.ne.s32.totalorder %s1892_s13, %s1888_s12  ;;  %p1973_p1 = scmp.eq.s32.totalorder %s1269_s18, 0 }
   0x9   : > { %p1977_p2 = scmp.eq.s32.totalorder %s1269_s18, 1  ;;  %p147_p3 = scmp.eq.s32.totalorder %s1270_s19, 1 }
   0xa   : > { %p1983_p4 = por %p1973_p1, %p61_p0  ;;  %p1271_p5 = scmp.ge.s32.totalorder %s1908_s17, 1 }
   0xb   : > { %p1988_p6 = por %p147_p3, %p61_p0  ;;  %p154_p7 = scmp.lt.s32.totalorder %s1908_s17, 3 }
   0xc   : > { %s2218_s22 = scalar_select %p1983_p4, 1, 0 }
   0xd   : > { %s2219_s23 = scalar_select %p1988_p6, 1, 0 }
   0xe   : > { %p1993_p8 = pnand %p1271_p5, %p154_p7  ;;  %s1910_s25 = smov [#allocation6]  }
   0xf   : > { %s170_s26 = sshll.u32 %s1910_s25, 4  ;;  %s39_s28 = sadd.s32 1, %s1904_s16  ;;  %s171_s26 = int_to_ptr.vmem [resolvable:$true] %s170_s26 }
  0x10   : > { %p1635_p9 = pneg %p1993_p8  ;;  %s1781_s29 = scalar_lea.vmem %s171_s26, 2048 }
  0x11   : > { %p1782_p13 = scmp.ne.s32.totalorder %s171_s26, %s1781_s29  ;;  %p1789_p5 = scmp.lt.s32.totalorder %s171_s26, %s171_s26 }
  0x12   : > { %p2002_p11 = pnand %p1635_p9, %p1973_p1  ;;  %p1790_p7 = scmp.lt.s32.totalorder %s1781_s29, %s1781_s29 }
  0x14   : > { %p1772_p12 = pneg %p2002_p11  ;;  %p1791_p6 = por %p1790_p7, %p1789_p5 }
  0x16   : > { %p1784_p0 = pnand %p1782_p13, %p1772_p12 }
  0x18   : > { %p1785_p3 = pneg %p1784_p0 }
  0x1a   : > { %p1792_p4 = pnand %p1791_p6, %p1785_p3 }
  0x1c   : > { %1795 = shalt.err (!%p1792_p4)
}
  0x1d   : > { %s1911_s30 = smov 64   ;;  %s1912_s4 = smov 4  }
  0x1e   : > { %1638 = dma.hbm_to_vmem [thread:$0]  (!%p2002_p11), %s2212_s1, 2048, %s171_s26, [#allocation7], %s1911_s30, %s1911_s30, %s1912_s4  }
  0x1f   : > { %p41_p6 = scmp.ge.s32.totalorder %s39_s28, 2  ;;  %s48_s7 = sadd.s32 1, %s1896_s14 }
  0x20   : > { %p55_p4 = scmp.ne.s32.totalorder %s1896_s14, %s1892_s13  ;;  %p56_p9 = scmp.eq.s32.totalorder %s1908_s17, 0 }
  0x21   : > { %s2234_s28 = smov (%p41_p6, %s39_s28), 0  ;;  %p1648_p0 = scmp.lt.s32.totalorder %s1908_s17, 2 }
  0x22   : > { %p2020_p12 = por %p56_p9, %p55_p4  ;;  %p2026_p13 = por %p1977_p2, %p55_p4 }
  0x23   : > { %s43_s10 = ssub.s32 %s1904_s16, %s2234_s28  ;;  %s190_s11 = sand.u32 1, %s1896_s14  }
  0x24   : > { %p46_p11 = scmp.eq.s32.totalorder %s43_s10, 0  ;;  %s1275_s18 = sshll.u32 %s190_s11, 8 }
  0x25   : > { %s1370_s25 = sshll.u32 %s1904_s16, 12  ;;  %s194_s30 = scalar_lea.vmem [#allocation3], %s1275_s18 }
  0x26   : > { %s2035_s19 = scalar_select %p46_p11, %s1896_s14, %s48_s7  }
  0x27   : > { %s203_s29 = scalar_lea.hbm %s2211_s0, %s1370_s25  ;;  %s204_s4 = sshll.u32 %s194_s30, 4  ;;  %s205_s4 = int_to_ptr.vmem [resolvable:$true] %s204_s4 }
  0x28   : > { %p2043_p2 = pnand %p1648_p0, %p2020_p12  ;;  %s191_s5 = scalar_lea.sflag [#allocation4], %s190_s11 }
  0x29   : > { %s1809_s6 = scalar_lea.vmem %s205_s4, 4096  ;;  %s1913_s7 = smov [#allocation3]  }
  0x2a   : > { %p1798_p3 = pneg %p2043_p2  ;;  %p1810_p5 = scmp.ne.s32.totalorder %s205_s4, %s1809_s6 }
  0x2b   : > { %s1814_s10 = sshll.u32 %s1913_s7, 4  ;;  %s1815_s10 = int_to_ptr.vmem [resolvable:$false] %s1814_s10 }
  0x2c   : > { %p1812_p7 = pnand %p1810_p5, %p1798_p3  ;;  %s1816_s25 = scalar_lea.vmem %s1815_s10, 8192 }
  0x2d   : > { %p1817_p4 = scmp.lt.s32.totalorder %s205_s4, %s1815_s10  ;;  %p1818_p9 = scmp.lt.s32.totalorder %s1816_s25, %s1809_s6 }
  0x2e   : > { %p1813_p6 = pneg %p1812_p7 }
  0x2f   : > { %p1819_p11 = por %p1818_p9, %p1817_p4 }
  0x31   : > { %p1820_p10 = pnand %p1819_p11, %p1813_p6 }
  0x33   : > { %1823 = shalt.err (!%p1820_p10)
}
  0x34   : > { %s1914_s8 = smov 128   ;;  %s1915_s18 = smov 8  }
  0x35   : > { %1642 = dma.hbm_to_vmem [thread:$0]  (!%p2043_p2), %s203_s29, 4096, %s205_s4, %s191_s5, %s1914_s8, %s1914_s8, %s1915_s18  }
  0x36   : > { %216 = sbr.rel (%p1993_p8) target bundleno = 372 (0x174), region = 32  ;;  %s2054_s11 = sand.u32 (!%p1993_p8), 1, %s1892_s13  }
  0x37   : > { %s1280_s26 = sshll.u32 (!%p1993_p8), %s2054_s11, 8  ;;  %s219_s27 = scalar_lea.sflag (!%p1993_p8), [#allocation4], %s2054_s11 }
  0x38   : > { %s2058_s30 = scalar_lea.vmem (!%p1993_p8), [#allocation3], %s1280_s26  ;;  %p2225_p12 = scmp.ne.s32.totalorder (!%p1993_p8), %s2218_s22, 0 }
  0x3b   : > { %1875 = dma.done.wait (%p2225_p12), %s219_s27, 4096  }
  0x3c   : > { %1877 = vsyncadd (%p2225_p12), %s219_s27, 4294963200 }
  0x3d   : > { %1879 = dma.done.wait (%p1973_p1), [#allocation7], 2048  }
  0x3e   : > { %1881 = vsyncadd (%p1973_p1), [#allocation7], 4294965248  ;;  %v1706_v0 = vld [vmem:[#allocation6 + $0x78] sm:$0xff]   ;;  %v1708_v2 = vld [vmem:[#allocation6 + $0x70] sm:$0xff]   ;;  %s1282_s24 = sshll.u32 %s2054_s11, 7  ;;  %s1403_s4 = sshll.u32 %s1900_s15, 11 }
  0x3f   : > { %v1707_v1 = vld [vmem:[#allocation6 + $0x38] sm:$0xff]   ;;  %1499 = vmatprep.subr.bf16.mxu0 %v1706_v0  ;;  %1611 = vmatprep.subr.bf16.mxu1 %v1706_v0  ;;  %v1709_v3 = vld [vmem:[#allocation6 + $0x30] sm:$0xff]   ;;  %v1710_v4 = vld [vmem:[#allocation6 + $0x68] sm:$0xff]   ;;  %s2112_s29 = scalar_lea.vmem [#allocation8], %s1282_s24  ;;  %s2159_s7 = scalar_lea.hbm %s2214_s3, %s1403_s4 }
  0x40   : > { %1500 = vmatpush3.bf16.msra.mxu0 %v1707_v1  ;;  %1619 = vmatpush3.bf16.msra.mxu1 %v1707_v1  ;;  %v1711_v5 = vld [vmem:[#allocation6 + $0x28] sm:$0xff]   ;;  %v1712_v6 = vld [vmem:[#allocation6 + $0x60] sm:$0xff]   ;;  %v1714_v8 = vld [vmem:[#allocation6 + $0x58] sm:$0xff]   ;;  %s1154_s21 = sshll.u32 %s2112_s29, 4  ;;  %s1140_s15 = scalar_lea.sflag [#allocation5], %s2054_s11  ;;  %s2161_s21 = int_to_ptr.vmem [resolvable:$true] %s1154_s21 }
  0x41   : > { %1501 = vmatprep.subr.bf16.mxu0 %v1708_v2  ;;  %1612 = vmatprep.subr.bf16.mxu1 %v1708_v2  ;;  %v1713_v7 = vld [vmem:[#allocation6 + $0x20] sm:$0xff]   ;;  %v1715_v9 = vld [vmem:[#allocation6 + $0x18] sm:$0xff]   ;;  %v1716_v10 = vld [vmem:[#allocation6 + $0x50] sm:$0xff]   ;;  %s1824_s10 = scalar_lea.vmem %s2161_s21, 2048  ;;  %s1916_s25 = smov [#allocation8]  }
  0x42   : > { %v1724_v11 = vld [vmem:[%s2058_s30 + $0x4] ss:$8 sps:$4 sm:$0xff]   ;;  %v1717_v13 = vld [vmem:[#allocation6 + $0x10] sm:$0xff]   ;;  %v1722_v18 = vld [vmem:[%s2058_s30] ss:$8 sps:$4 sm:$0xff]   ;;  %p1825_p1 = scmp.ne.s32.totalorder %s2161_s21, %s1824_s10  ;;  %s1828_s8 = sshll.u32 %s1916_s25, 4  ;;  %s1829_s8 = int_to_ptr.vmem [resolvable:$false] %s1828_s8 }
  0x43   : > { %v1727_v12 = vld [vmem:[%s2058_s30 + $0x84] ss:$8 sps:$4 sm:$0xff]   ;;  %680 = vmatprep.mubr.bf16.mxu0 %v1724_v11  ;;  %v1725_v19 = vld [vmem:[%s2058_s30 + $0x80] ss:$8 sps:$4 sm:$0xff]   ;;  %v1728_v20 = vld [vmem:[%s2058_s30 + $0x14] ss:$8 sps:$4 sm:$0xff]   ;;  %p1831_p0 = scmp.lt.s32.totalorder %s2161_s21, %s1829_s8 }
  0x44   : > { %1502 = vmatpush3.bf16.msra.mxu0 %v1709_v3  ;;  %1620 = vmatpush3.bf16.msra.mxu1 %v1709_v3  ;;  %v1718_v14 = vld [vmem:[#allocation6 + $0x48] sm:$0xff]   ;;  %v1720_v16 = vld [vmem:[#allocation6 + $0x40] sm:$0xff]   ;;  %v1730_v21 = vld [vmem:[%s2058_s30 + $0x94] ss:$8 sps:$4 sm:$0xff]   ;;  %p1826_p8 = pnand %p1825_p1, %p2026_p13  ;;  %s1830_s18 = scalar_lea.vmem %s1829_s8, 4096 }
  0x45   : > { %1503 = vmatprep.subr.bf16.mxu0 %v1710_v4  ;;  %1613 = vmatprep.subr.bf16.mxu1 %v1710_v4  ;;  %v1719_v15 = vld [vmem:[#allocation6 + $0x8] sm:$0xff]   ;;  %v1721_v17 = vld [vmem:[#allocation6] sm:$0xff]   ;;  %v1732_v22 = vld [vmem:[%s2058_s30 + $0x10] ss:$8 sps:$4 sm:$0xff]   ;;  %p1832_p2 = scmp.lt.s32.totalorder %s1830_s18, %s1824_s10 }
  0x46   : > { %744 = vmatprep.mubr.bf16.mxu1 %v1727_v12  ;;  %v1733_v23 = vld [vmem:[%s2058_s30 + $0x90] ss:$8 sps:$4 sm:$0xff]   ;;  %v1734_v24 = vld [vmem:[%s2058_s30 + $0x24] ss:$8 sps:$4 sm:$0xff]   ;;  %v1738_v26 = vld [vmem:[%s2058_s30 + $0x20] ss:$8 sps:$4 sm:$0xff]   ;;  %p1827_p10 = pneg %p1826_p8 }
  0x47   : > { %v1736_v25 = vld [vmem:[%s2058_s30 + $0xa4] ss:$8 sps:$4 sm:$0xff]   ;;  %v1739_v27 = vld [vmem:[%s2058_s30 + $0xa0] ss:$8 sps:$4 sm:$0xff]   ;;  %v1740_v28 = vld [vmem:[%s2058_s30 + $0x34] ss:$8 sps:$4 sm:$0xff]   ;;  %p1833_p3 = por %p1832_p2, %p1831_p0 }
  0x48   : > { %1504 = vmatpush3.bf16.msra.mxu0 %v1711_v5  ;;  %1621 = vmatpush3.bf16.msra.mxu1 %v1711_v5  ;;  %v1742_v29 = vld [vmem:[%s2058_s30 + $0xb4] ss:$8 sps:$4 sm:$0xff]   ;;  %v1744_v30 = vld [vmem:[%s2058_s30 + $0x30] ss:$8 sps:$4 sm:$0xff]   ;;  %v1746_v32 = vld [vmem:[%s2058_s30 + $0x44] ss:$8 sps:$4 sm:$0xff]  }
  0x49   : > { %1505 = vmatprep.subr.bf16.mxu0 %v1712_v6  ;;  %1614 = vmatprep.subr.bf16.mxu1 %v1712_v6  ;;  %v1745_v31 = vld [vmem:[%s2058_s30 + $0xb0] ss:$8 sps:$4 sm:$0xff]   ;;  %v1748_v33 = vld [vmem:[%s2058_s30 + $0xc4] ss:$8 sps:$4 sm:$0xff]   ;;  %v1750_v34 = vld [vmem:[%s2058_s30 + $0x40] ss:$8 sps:$4 sm:$0xff]   ;;  %p1834_p5 = pnand %p1833_p3, %p1827_p10 }
  0x4a   : > { %v1751_v35 = vld [vmem:[%s2058_s30 + $0xc0] ss:$8 sps:$4 sm:$0xff]   ;;  %v1752_v36 = vld [vmem:[%s2058_s30 + $0x54] ss:$8 sps:$4 sm:$0xff]   ;;  %v1756_v38 = vld [vmem:[%s2058_s30 + $0x50] ss:$8 sps:$4 sm:$0xff]  }
  0x4b   : > { %v1754_v37 = vld [vmem:[%s2058_s30 + $0xd4] ss:$8 sps:$4 sm:$0xff]   ;;  %v1757_v39 = vld [vmem:[%s2058_s30 + $0xd0] ss:$8 sps:$4 sm:$0xff]   ;;  %v1758_v40 = vld [vmem:[%s2058_s30 + $0x64] ss:$8 sps:$4 sm:$0xff]  }
  0x4c   : > { %1506 = vmatpush3.bf16.msra.mxu0 %v1713_v7  ;;  %1622 = vmatpush3.bf16.msra.mxu1 %v1713_v7  ;;  %v1760_v41 = vld [vmem:[%s2058_s30 + $0xe4] ss:$8 sps:$4 sm:$0xff]   ;;  %v1762_v42 = vld [vmem:[%s2058_s30 + $0x60] ss:$8 sps:$4 sm:$0xff]   ;;  %v1764_v44 = vld [vmem:[%s2058_s30 + $0x74] ss:$8 sps:$4 sm:$0xff]  }
  0x4d   : > { %1507 = vmatprep.subr.bf16.mxu0 %v1714_v8  ;;  %1615 = vmatprep.subr.bf16.mxu1 %v1714_v8  ;;  %v1763_v43 = vld [vmem:[%s2058_s30 + $0xe0] ss:$8 sps:$4 sm:$0xff]   ;;  %v1766_v45 = vld [vmem:[%s2058_s30 + $0xf4] ss:$8 sps:$4 sm:$0xff]   ;;  %v1768_v46 = vld [vmem:[%s2058_s30 + $0x70] ss:$8 sps:$4 sm:$0xff]  }
  0x4e   : > { %v1769_v47 = vld [vmem:[%s2058_s30 + $0xf0] ss:$8 sps:$4 sm:$0xff]   ;;  %v2103_v53 = vld [vmem:[%s2213_s2] ss:$0 sm:$0xff] }
  0x50   : > { %1508 = vmatpush3.bf16.msra.mxu0 %v1715_v9  ;;  %1623 = vmatpush3.bf16.msra.mxu1 %v1715_v9 }
  0x51   : > { %1509 = vmatprep.subr.bf16.mxu0 %v1716_v10  ;;  %1616 = vmatprep.subr.bf16.mxu1 %v1716_v10 }
  0x54   : > { %1510 = vmatpush3.bf16.msra.mxu0 %v1717_v13  ;;  %1624 = vmatpush3.bf16.msra.mxu1 %v1717_v13 }
  0x55   : > { %1511 = vmatprep.subr.bf16.mxu0 %v1718_v14  ;;  %1617 = vmatprep.subr.bf16.mxu1 %v1718_v14 }
  0x58   : > { %1512 = vmatpush3.bf16.msra.mxu0 %v1719_v15  ;;  %1625 = vmatpush3.bf16.msra.mxu1 %v1719_v15 }
  0x59   : > { %1513 = vmatprep.subr.bf16.mxu0 %v1720_v16  ;;  %1618 = vmatprep.subr.bf16.mxu1 %v1720_v16 }
  0x5c   : > { %1514 = vmatpush3.bf16.msra.mxu0 %v1721_v17  ;;  %1626 = vmatpush3.bf16.msra.mxu1 %v1721_v17 }
  0x5f   : > { %681 = vmatmul.mubr.bf16.vlgmr.msra.gmra.mxu0 %v1722_v18  ;;  %745 = vmatmul.mubr.bf16.vlgmr.msra.gmra.mxu1 %v1725_v19 }
  0x60   : > { %688 = vmatprep.mubr.bf16.mxu0 %v1728_v20  ;;  %752 = vmatprep.mubr.bf16.mxu1 %v1730_v21 }
  0x67   : > { %689 = vmatmul.mubr.bf16.gmra.mxu0 %v1732_v22  ;;  %753 = vmatmul.mubr.bf16.gmra.mxu1 %v1733_v23 }
  0x68   : > { %696 = vmatprep.mubr.bf16.mxu0 %v1734_v24  ;;  %760 = vmatprep.mubr.bf16.mxu1 %v1736_v25 }
  0x6f   : > { %697 = vmatmul.mubr.bf16.gmra.mxu0 %v1738_v26  ;;  %761 = vmatmul.mubr.bf16.gmra.mxu1 %v1739_v27 }
  0x70   : > { %704 = vmatprep.mubr.bf16.mxu0 %v1740_v28  ;;  %768 = vmatprep.mubr.bf16.mxu1 %v1742_v29 }
  0x77   : > { %705 = vmatmul.mubr.bf16.gmra.mxu0 %v1744_v30  ;;  %769 = vmatmul.mubr.bf16.gmra.mxu1 %v1745_v31 }
  0x78   : > { %712 = vmatprep.mubr.bf16.mxu0 %v1746_v32  ;;  %776 = vmatprep.mubr.bf16.mxu1 %v1748_v33 }
  0x7f   : > { %713 = vmatmul.mubr.bf16.gmra.mxu0 %v1750_v34  ;;  %777 = vmatmul.mubr.bf16.gmra.mxu1 %v1751_v35 }
  0x80   : > { %720 = vmatprep.mubr.bf16.mxu0 %v1752_v36  ;;  %784 = vmatprep.mubr.bf16.mxu1 %v1754_v37 }
  0x87   : > { %721 = vmatmul.mubr.bf16.gmra.mxu0 %v1756_v38  ;;  %785 = vmatmul.mubr.bf16.gmra.mxu1 %v1757_v39 }
  0x88   : > { %728 = vmatprep.mubr.bf16.mxu0 %v1758_v40  ;;  %792 = vmatprep.mubr.bf16.mxu1 %v1760_v41 }
  0x8f   : > { %729 = vmatmul.mubr.bf16.gmra.mxu0 %v1762_v42  ;;  %793 = vmatmul.mubr.bf16.gmra.mxu1 %v1763_v43 }
  0x90   : > { %736 = vmatprep.mubr.bf16.mxu0 %v1764_v44  ;;  %800 = vmatprep.mubr.bf16.mxu1 %v1766_v45 }
  0x97   : > { %737 = vmatmul.mubr.bf16.gmra.mxu0 %v1768_v46  ;;  %801 = vmatmul.mubr.bf16.gmra.mxu1 %v1769_v47 }
 0x11f   : > { %v1515_v48 = vpop.f32.mrf.mxu0  ;;  %v1563_v49 = vpop.f32.mrf.mxu1 }
 0x121   : > { %v1516_v50 = vpop.f32.mrf.mxu0  ;;  %v1564_v51 = vpop.f32.mrf.mxu1 }
 0x122   : > { %v1517_v52 = vadd.f32 %v1516_v50, %v1515_v48  ;;  %v1565_v54 = vadd.f32 %v1564_v51, %v1563_v49 }
 0x123   : > { %v1518_v55 = vpop.f32.mrf.mxu0  ;;  %v1566_v56 = vpop.f32.mrf.mxu1 }
 0x124   : > { %v915_v57 = vadd.f32 %v1517_v52, %v2103_v53  ;;  %v931_v58 = vadd.f32 %v1565_v54, %v2103_v53 }
 0x125   : > { %v1519_v59 = vpop.f32.mrf.mxu0  ;;  %v1567_v60 = vpop.f32.mrf.mxu1 }
 0x126   : > { %v1520_v61 = vadd.f32 %v1519_v59, %v1518_v55  ;;  %v1568_v62 = vadd.f32 %v1567_v60, %v1566_v56  ;;  %v947_v3 = vmax.f32 %v915_v57, 0.0  ;;  %v963_v4 = vmax.f32 %v931_v58, 0.0 }
 0x127   : > { %v1521_v63 = vpop.f32.mrf.mxu0  ;;  %v1569_v0 = vpop.f32.mrf.mxu1 }
 0x128   : > { %v916_v1 = vadd.f32 %v1520_v61, %v2103_v53  ;;  %v932_v2 = vadd.f32 %v1568_v62, %v2103_v53 }
 0x129   : > { %v1522_v5 = vpop.f32.mrf.mxu0  ;;  %v1570_v6 = vpop.f32.mrf.mxu1 }
 0x12a   : > { %v948_v7 = vmax.f32 %v916_v1, 0.0  ;;  %v964_v8 = vmax.f32 %v932_v2, 0.0  ;;  %v1523_v9 = vadd.f32 %v1522_v5, %v1521_v63  ;;  %v1571_v10 = vadd.f32 %v1570_v6, %v1569_v0 }
 0x12b   : > { %v1524_v11 = vpop.f32.mrf.mxu0  ;;  %v1572_v12 = vpop.f32.mrf.mxu1 }
 0x12c   : > { %v1407_v13 = vpack.c.bf16 %v948_v7, %v947_v3  ;;  %v1447_v14 = vpack.c.bf16 %v964_v8, %v963_v4  ;;  %v917_v15 = vadd.f32 %v1523_v9, %v2103_v53  ;;  %v933_v16 = vadd.f32 %v1571_v10, %v2103_v53 }
 0x12d   : > { %v1525_v17 = vpop.f32.mrf.mxu0  ;;  %v1573_v18 = vpop.f32.mrf.mxu1 }
 0x12e   : > { %1408 = vst [vmem:[%s2112_s29] sm:$0xff] %v1407_v13   ;;  %1491 = vst [vmem:[%s2112_s29 + $0x40] sm:$0xff] %v1447_v14   ;;  %v1526_v19 = vadd.f32 %v1525_v17, %v1524_v11  ;;  %v1574_v20 = vadd.f32 %v1573_v18, %v1572_v12  ;;  %v949_v25 = vmax.f32 %v917_v15, 0.0  ;;  %v965_v26 = vmax.f32 %v933_v16, 0.0 }
 0x12f   : > { %v1527_v21 = vpop.f32.mrf.mxu0  ;;  %v1575_v22 = vpop.f32.mrf.mxu1 }
 0x130   : > { %v918_v23 = vadd.f32 %v1526_v19, %v2103_v53  ;;  %v934_v24 = vadd.f32 %v1574_v20, %v2103_v53 }
 0x131   : > { %v1528_v27 = vpop.f32.mrf.mxu0  ;;  %v1576_v28 = vpop.f32.mrf.mxu1 }
 0x132   : > { %v950_v29 = vmax.f32 %v918_v23, 0.0  ;;  %v966_v30 = vmax.f32 %v934_v24, 0.0  ;;  %v1529_v31 = vadd.f32 %v1528_v27, %v1527_v21  ;;  %v1577_v32 = vadd.f32 %v1576_v28, %v1575_v22 }
 0x133   : > { %v1530_v33 = vpop.f32.mrf.mxu0  ;;  %v1578_v34 = vpop.f32.mrf.mxu1 }
 0x134   : > { %v1412_v35 = vpack.c.bf16 %v950_v29, %v949_v25  ;;  %v1452_v36 = vpack.c.bf16 %v966_v30, %v965_v26  ;;  %v919_v37 = vadd.f32 %v1529_v31, %v2103_v53  ;;  %v935_v38 = vadd.f32 %v1577_v32, %v2103_v53 }
 0x135   : > { %v1531_v39 = vpop.f32.mrf.mxu0  ;;  %v1579_v40 = vpop.f32.mrf.mxu1 }
 0x136   : > { %1484 = vst [vmem:[%s2112_s29 + $0x8] sm:$0xff] %v1412_v35   ;;  %1492 = vst [vmem:[%s2112_s29 + $0x48] sm:$0xff] %v1452_v36   ;;  %v1532_v41 = vadd.f32 %v1531_v39, %v1530_v33  ;;  %v1580_v42 = vadd.f32 %v1579_v40, %v1578_v34  ;;  %v951_v47 = vmax.f32 %v919_v37, 0.0  ;;  %v967_v48 = vmax.f32 %v935_v38, 0.0 }
 0x137   : > { %v1533_v43 = vpop.f32.mrf.mxu0  ;;  %v1581_v44 = vpop.f32.mrf.mxu1 }
 0x138   : > { %v920_v45 = vadd.f32 %v1532_v41, %v2103_v53  ;;  %v936_v46 = vadd.f32 %v1580_v42, %v2103_v53 }
 0x139   : > { %v1534_v49 = vpop.f32.mrf.mxu0  ;;  %v1582_v50 = vpop.f32.mrf.mxu1 }
 0x13a   : > { %v952_v51 = vmax.f32 %v920_v45, 0.0  ;;  %v968_v52 = vmax.f32 %v936_v46, 0.0  ;;  %v1535_v54 = vadd.f32 %v1534_v49, %v1533_v43  ;;  %v1583_v55 = vadd.f32 %v1582_v50, %v1581_v44 }
 0x13b   : > { %v1536_v56 = vpop.f32.mrf.mxu0  ;;  %v1584_v57 = vpop.f32.mrf.mxu1 }
 0x13c   : > { %v1417_v58 = vpack.c.bf16 %v952_v51, %v951_v47  ;;  %v1457_v59 = vpack.c.bf16 %v968_v52, %v967_v48  ;;  %v921_v60 = vadd.f32 %v1535_v54, %v2103_v53  ;;  %v937_v61 = vadd.f32 %v1583_v55, %v2103_v53 }
 0x13d   : > { %v1537_v62 = vpop.f32.mrf.mxu0  ;;  %v1585_v63 = vpop.f32.mrf.mxu1 }
 0x13e   : > { %1485 = vst [vmem:[%s2112_s29 + $0x10] sm:$0xff] %v1417_v58   ;;  %1493 = vst [vmem:[%s2112_s29 + $0x50] sm:$0xff] %v1457_v59   ;;  %v1538_v0 = vadd.f32 %v1537_v62, %v1536_v56  ;;  %v1586_v1 = vadd.f32 %v1585_v63, %v1584_v57  ;;  %v953_v6 = vmax.f32 %v921_v60, 0.0  ;;  %v969_v7 = vmax.f32 %v937_v61, 0.0 }
 0x13f   : > { %v1539_v2 = vpop.f32.mrf.mxu0  ;;  %v1587_v3 = vpop.f32.mrf.mxu1 }
 0x140   : > { %v922_v4 = vadd.f32 %v1538_v0, %v2103_v53  ;;  %v938_v5 = vadd.f32 %v1586_v1, %v2103_v53 }
 0x141   : > { %v1540_v8 = vpop.f32.mrf.mxu0  ;;  %v1588_v9 = vpop.f32.mrf.mxu1 }
 0x142   : > { %v954_v10 = vmax.f32 %v922_v4, 0.0  ;;  %v970_v11 = vmax.f32 %v938_v5, 0.0  ;;  %v1541_v12 = vadd.f32 %v1540_v8, %v1539_v2  ;;  %v1589_v13 = vadd.f32 %v1588_v9, %v1587_v3 }
 0x143   : > { %v1542_v14 = vpop.f32.mrf.mxu0  ;;  %v1590_v15 = vpop.f32.mrf.mxu1 }
 0x144   : > { %v1422_v16 = vpack.c.bf16 %v954_v10, %v953_v6  ;;  %v1462_v17 = vpack.c.bf16 %v970_v11, %v969_v7  ;;  %v923_v18 = vadd.f32 %v1541_v12, %v2103_v53  ;;  %v939_v19 = vadd.f32 %v1589_v13, %v2103_v53 }
 0x145   : > { %v1543_v20 = vpop.f32.mrf.mxu0  ;;  %v1591_v21 = vpop.f32.mrf.mxu1 }
 0x146   : > { %1486 = vst [vmem:[%s2112_s29 + $0x18] sm:$0xff] %v1422_v16   ;;  %1494 = vst [vmem:[%s2112_s29 + $0x58] sm:$0xff] %v1462_v17   ;;  %v1544_v22 = vadd.f32 %v1543_v20, %v1542_v14  ;;  %v1592_v23 = vadd.f32 %v1591_v21, %v1590_v15  ;;  %v955_v28 = vmax.f32 %v923_v18, 0.0  ;;  %v971_v29 = vmax.f32 %v939_v19, 0.0 }
 0x147   : > { %v1545_v24 = vpop.f32.mrf.mxu0  ;;  %v1593_v25 = vpop.f32.mrf.mxu1 }
 0x148   : > { %v924_v26 = vadd.f32 %v1544_v22, %v2103_v53  ;;  %v940_v27 = vadd.f32 %v1592_v23, %v2103_v53 }
 0x149   : > { %v1546_v30 = vpop.f32.mrf.mxu0  ;;  %v1594_v31 = vpop.f32.mrf.mxu1 }
 0x14a   : > { %v956_v32 = vmax.f32 %v924_v26, 0.0  ;;  %v972_v33 = vmax.f32 %v940_v27, 0.0  ;;  %v1547_v34 = vadd.f32 %v1546_v30, %v1545_v24  ;;  %v1595_v35 = vadd.f32 %v1594_v31, %v1593_v25 }
 0x14b   : > { %v1548_v36 = vpop.f32.mrf.mxu0  ;;  %v1596_v37 = vpop.f32.mrf.mxu1 }
 0x14c   : > { %v1427_v38 = vpack.c.bf16 %v956_v32, %v955_v28  ;;  %v1467_v39 = vpack.c.bf16 %v972_v33, %v971_v29  ;;  %v925_v40 = vadd.f32 %v1547_v34, %v2103_v53  ;;  %v941_v41 = vadd.f32 %v1595_v35, %v2103_v53 }
 0x14d   : > { %v1549_v42 = vpop.f32.mrf.mxu0  ;;  %v1597_v43 = vpop.f32.mrf.mxu1 }
 0x14e   : > { %1487 = vst [vmem:[%s2112_s29 + $0x20] sm:$0xff] %v1427_v38   ;;  %1495 = vst [vmem:[%s2112_s29 + $0x60] sm:$0xff] %v1467_v39   ;;  %v1550_v44 = vadd.f32 %v1549_v42, %v1548_v36  ;;  %v1598_v45 = vadd.f32 %v1597_v43, %v1596_v37  ;;  %v957_v50 = vmax.f32 %v925_v40, 0.0  ;;  %v973_v51 = vmax.f32 %v941_v41, 0.0 }
 0x14f   : > { %v1551_v46 = vpop.f32.mrf.mxu0  ;;  %v1599_v47 = vpop.f32.mrf.mxu1 }
 0x150   : > { %v926_v48 = vadd.f32 %v1550_v44, %v2103_v53  ;;  %v942_v49 = vadd.f32 %v1598_v45, %v2103_v53 }
 0x151   : > { %v1552_v52 = vpop.f32.mrf.mxu0  ;;  %v1600_v54 = vpop.f32.mrf.mxu1 }
 0x152   : > { %v958_v55 = vmax.f32 %v926_v48, 0.0  ;;  %v974_v56 = vmax.f32 %v942_v49, 0.0  ;;  %v1553_v57 = vadd.f32 %v1552_v52, %v1551_v46  ;;  %v1601_v58 = vadd.f32 %v1600_v54, %v1599_v47 }
 0x153   : > { %v1554_v59 = vpop.f32.mrf.mxu0  ;;  %v1602_v60 = vpop.f32.mrf.mxu1 }
 0x154   : > { %v1432_v61 = vpack.c.bf16 %v958_v55, %v957_v50  ;;  %v1472_v62 = vpack.c.bf16 %v974_v56, %v973_v51  ;;  %v927_v63 = vadd.f32 %v1553_v57, %v2103_v53  ;;  %v943_v0 = vadd.f32 %v1601_v58, %v2103_v53 }
 0x155   : > { %v1555_v1 = vpop.f32.mrf.mxu0  ;;  %v1603_v2 = vpop.f32.mrf.mxu1 }
 0x156   : > { %1488 = vst [vmem:[%s2112_s29 + $0x28] sm:$0xff] %v1432_v61   ;;  %1496 = vst [vmem:[%s2112_s29 + $0x68] sm:$0xff] %v1472_v62   ;;  %v1556_v3 = vadd.f32 %v1555_v1, %v1554_v59  ;;  %v1604_v4 = vadd.f32 %v1603_v2, %v1602_v60  ;;  %v959_v9 = vmax.f32 %v927_v63, 0.0  ;;  %v975_v10 = vmax.f32 %v943_v0, 0.0 }
 0x157   : > { %v1557_v5 = vpop.f32.mrf.mxu0  ;;  %v1605_v6 = vpop.f32.mrf.mxu1 }
 0x158   : > { %v928_v7 = vadd.f32 %v1556_v3, %v2103_v53  ;;  %v944_v8 = vadd.f32 %v1604_v4, %v2103_v53 }
 0x159   : > { %v1558_v11 = vpop.f32.mrf.mxu0  ;;  %v1606_v12 = vpop.f32.mrf.mxu1 }
 0x15a   : > { %v960_v13 = vmax.f32 %v928_v7, 0.0  ;;  %v976_v14 = vmax.f32 %v944_v8, 0.0  ;;  %v1559_v15 = vadd.f32 %v1558_v11, %v1557_v5  ;;  %v1607_v16 = vadd.f32 %v1606_v12, %v1605_v6 }
 0x15b   : > { %v1560_v17 = vpop.f32.mrf.mxu0  ;;  %v1608_v18 = vpop.f32.mrf.mxu1 }
 0x15c   : > { %v1437_v19 = vpack.c.bf16 %v960_v13, %v959_v9  ;;  %v1477_v20 = vpack.c.bf16 %v976_v14, %v975_v10  ;;  %v929_v23 = vadd.f32 %v1559_v15, %v2103_v53  ;;  %v945_v24 = vadd.f32 %v1607_v16, %v2103_v53 }
 0x15d   : > { %v1561_v21 = vpop.f32.mrf.mxu0  ;;  %v1609_v22 = vpop.f32.mrf.mxu1 }
 0x15e   : > { %1489 = vst [vmem:[%s2112_s29 + $0x30] sm:$0xff] %v1437_v19   ;;  %1497 = vst [vmem:[%s2112_s29 + $0x70] sm:$0xff] %v1477_v20   ;;  %v1562_v25 = vadd.f32 %v1561_v21, %v1560_v17  ;;  %v1610_v26 = vadd.f32 %v1609_v22, %v1608_v18  ;;  %v961_v29 = vmax.f32 %v929_v23, 0.0  ;;  %v977_v30 = vmax.f32 %v945_v24, 0.0 }
 0x160   : > { %v930_v27 = vadd.f32 %v1562_v25, %v2103_v53  ;;  %v946_v28 = vadd.f32 %v1610_v26, %v2103_v53 }
 0x162   : > { %v962_v31 = vmax.f32 %v930_v27, 0.0  ;;  %v978_v32 = vmax.f32 %v946_v28, 0.0 }
 0x164   : > { %v1442_v33 = vpack.c.bf16 %v962_v31, %v961_v29  ;;  %v1482_v34 = vpack.c.bf16 %v978_v32, %v977_v30 }
 0x166   : > { %1490 = vst [vmem:[%s2112_s29 + $0x38] sm:$0xff] %v1442_v33   ;;  %1498 = vst [vmem:[%s2112_s29 + $0x78] sm:$0xff] %v1482_v34  }
 0x167   : > { %1837 = shalt.err (!%p1834_p5)
}
 0x168   : > { %s1838_s26 = scalar_lea.hbm %s2159_s7, 2048  ;;  %s1842_s20 = scalar_lea.hbm %s2214_s3, 4096 }
 0x169   : > { %p1839_p7 = scmp.ne.s32.totalorder %s2159_s7, %s1838_s26  ;;  %p1843_p9 = scmp.lt.s32.totalorder %s2159_s7, %s2214_s3 }
 0x16a   : > { %p1844_p11 = scmp.lt.s32.totalorder %s1842_s20, %s1838_s26 }
 0x16b   : > { %p1840_p6 = pnand %p1839_p7, %p2026_p13 }
 0x16c   : > { %p1845_p12 = por %p1844_p11, %p1843_p9 }
 0x16d   : > { %p1841_p4 = pneg %p1840_p6 }
 0x16f   : > { %p1846_p1 = pnand %p1845_p12, %p1841_p4 }
 0x171   : > { %1849 = shalt.err (!%p1846_p1)
}
 0x172   : > { %s1917_s29 = smov 64   ;;  %s1918_s4 = smov 4  }
 0x173   : > { %1633 = dma.vmem_to_hbm [thread:$0]  (%p2026_p13), %s2161_s21, 2048, %s2159_s7, %s1140_s15, %s1917_s29, %s1917_s29, %s1918_s4  }
 0x174 PF: > { %s1169_s5 = sand.u32 1, %s1888_s12   ;;  %p2226_p8 = scmp.ne.s32.totalorder %s2219_s23, 0 }
 0x175   : > { %p2227_p10 = scmp.ge.s32.totalorder %s1908_s17, 2  ;;  %s1170_s6 = scalar_lea.sflag [#allocation5], %s1169_s5 }
 0x177   : > { %p1644_p0 = pnand %p2227_p10, %p2226_p8 }
 0x179   : > { %p1645_p2 = pneg %p1644_p0 }
 0x17b   : > { %1883 = dma.done.wait (%p1645_p2), %s1170_s6, 2048  }
 0x17c   : > { %1885 = vsyncadd (%p1645_p2), %s1170_s6, 4294965248  ;;  %s20_s17 = sadd.s32 1, %s1908_s17   ;;  %s2228_s12 = smov %s1892_s13 }
 0x17d   : > { %p17_p3 = scmp.ge.s32.totalorder %s20_s17, 4   ;;  %s2229_s13 = smov %s1896_s14 }
 0x17e   : > { %s2230_s14 = smov %s2035_s19  ;;  %s2231_s15 = smov %s1904_s16 }
 0x17f   : > { %s2232_s16 = smov %s2234_s28  ;;  %19 = sbr.rel (!%p17_p3) target bundleno = 7 (0x7), region = 93 }
 0x184   :  { %1175 = vsyncpa [#allocation4], 1 }
 0x185   :  { %1177 = vsyncpa [#allocation4 + $0x1], 1 }
 0x186   :  { %1178 = vsyncpa [#allocation7], 1 }
 0x187   :  { %1179 = vsyncpa [#allocation5], 1 }
 0x188   :  { %1181 = vsyncpa [#allocation5 + $0x1], 1 }

</bundles_post_ra>
